<compile_context>
chip_gen: v6e
topology: v6e:2x2x1
jax: 0.10.0
libtpu: 0.0.40
codegen_flags: <defaults>
</compile_context>

<pallas_src>
import functools
import math

import jax
import jax.numpy as jnp
from jax.experimental import pallas as pl
from jax.experimental.pallas import tpu as pltpu


def _round_up(x, m):
    return (x + m - 1) // m * m


def _pick_tile(n):
    """Row tile: multiple of 32 (int8 adj sublane tiling), <= 256 rows to bound
    the O(tile*N) softmax temporaries, and >= 2 grid blocks when possible so the
    'parallel' grid axis can shard across v7x's two TensorCores."""
    if n % 32 != 0:
        return n  # single full block; tail masking not implemented
    for tile in (256, 128, 64, 32):
        if n % tile == 0 and n // tile >= 2:
            return tile
    return n


# --------------------------- projection kernel ------------------------------
def _gat_project_kernel(h_ref, w_ref, wa12_ref, wh_ref, wh12_ref):
    """Wh = h @ W_stack (stored bf16) and Wh12 = h @ [W a1 | W a2] (f32)."""
    bf16 = jnp.bfloat16
    f32 = jnp.float32
    h_bf = h_ref[...].astype(bf16)                        # (tile, F_in)
    wh = jnp.dot(h_bf, w_ref[...].astype(bf16),
                 preferred_element_type=f32)              # (tile, width)
    wh_ref[...] = wh.astype(wh_ref.dtype)
    wh12_ref[...] = jnp.dot(h_bf, wa12_ref[...].astype(bf16),
                            preferred_element_type=f32)   # (tile, 2H)


# ---------------------------- attention kernel -------------------------------
def _gat_attention_kernel(adj_ref, wh_ref, wh1_ref, wh2t_ref, out_ref, *,
                          num_heads, f_out, alpha, apply_elu, out_width):
    f32 = jnp.float32
    bf16 = jnp.bfloat16
    neg = f32(-2.0 ** 31)                                 # PyTorch padding value

    # Additive adjacency bias: computed once per block, shared by all heads.
    bias = jnp.where(adj_ref[...] != 0, f32(0.0), neg)    # (tile, N) f32

    wh = wh_ref[...]                                      # (N, width)  bf16
    wh1 = wh1_ref[...]                                    # (tile, H)   f32
    wh2t = wh2t_ref[...]                                  # (H, N)      f32
    tile = bias.shape[0]

    pieces = []
    for k in range(num_heads):                            # small static loop
        e = wh1[:, k:k + 1] + wh2t[k:k + 1, :]            # (tile, N)
        e = jnp.maximum(e, alpha * e)                     # LeakyReLU(alpha)
        att = e + bias
        att = att - jnp.max(att, axis=1, keepdims=True)   # row-wise softmax
        p = jnp.exp(att)                                  # un-normalised
        inv = pl.reciprocal(jnp.sum(p, axis=1, keepdims=True), approx=True)
        wh_k = wh[:, k * f_out:(k + 1) * f_out]           # (N, f_out) bf16
        # F.dropout(attention, training=False) -> identity.
        hp = jnp.dot(p.astype(bf16), wh_k,
                     preferred_element_type=f32) * inv    # normalise post-matmul
        if apply_elu:
            hp = jnp.where(hp > 0, hp, jnp.exp(hp) - 1.0)  # ELU
        pieces.append(hp)

    res = pieces[0] if num_heads == 1 else jnp.concatenate(pieces, axis=1)
    pad = out_width - num_heads * f_out
    if pad:
        res = jnp.concatenate([res, jnp.zeros((tile, pad), f32)], axis=1)
    out_ref[...] = res.astype(out_ref.dtype)              # lane-dense store


# ------------------------------ level wrapper --------------------------------
def gat_multihead_layer(h, adj_mask_i8, w_list, a_list, *, alpha, apply_elu,
                        out_dtype):
    """All heads of one GraphAttentionLayer level as two Pallas calls.

    Returns (N, round_up(H * f_out, 128)); columns beyond H * f_out are zero.
    """
    n, f_in = h.shape
    num_heads = len(w_list)
    f_out = w_list[0].shape[1]
    width = num_heads * f_out
    out_width = _round_up(width, 128)

    tile = _pick_tile(n)
    grid = (n // tile,)

    # Stack per-head weights at their TRUE width (no MXU-wasting zero pad);
    # fold the attention vectors through W: [W a1 | W a2] -> (F_in, 2H), tiny.
    w_stack = jnp.concatenate(w_list, axis=1)                          # (F_in, width)
    wa1 = jnp.concatenate([jnp.dot(w, a[:f_out]) for w, a in zip(w_list, a_list)], axis=1)
    wa2 = jnp.concatenate([jnp.dot(w, a[f_out:]) for w, a in zip(w_list, a_list)], axis=1)
    wa12 = jnp.concatenate([wa1, wa2], axis=1)                         # (F_in, 2H)

    # ---- 1. projection: Wh (bf16) and the folded logit halves, once per level
    wh_bf16, wh12 = pl.pallas_call(
        _gat_project_kernel,
        out_shape=(jax.ShapeDtypeStruct((n, width), jnp.bfloat16),
                   jax.ShapeDtypeStruct((n, 2 * num_heads), jnp.float32)),
        grid_spec=pltpu.PrefetchScalarGridSpec(
            num_scalar_prefetch=0,
            grid=grid,
            in_specs=[
                pl.BlockSpec((tile, f_in), lambda i: (i, 0)),          # h rows
                pl.BlockSpec((f_in, width), lambda i: (0, 0)),         # W (stacked)
                pl.BlockSpec((f_in, 2 * num_heads), lambda i: (0, 0)),  # [W a1 | W a2]
            ],
            out_specs=[
                pl.BlockSpec((tile, width), lambda i: (i, 0)),
                pl.BlockSpec((tile, 2 * num_heads), lambda i: (i, 0)),
            ],
        ),
        compiler_params=pltpu.CompilerParams(
            dimension_semantics=("parallel",)),
    )(h, w_stack, wa12)

    wh1 = wh12[:, :num_heads]                 # (N, H)
    wh2t = wh12[:, num_heads:].T              # (H, N) -- layout plumbing only

    # ---- 2. attention: gridded over row blocks, adj streamed once ----
    kernel = functools.partial(_gat_attention_kernel, num_heads=num_heads,
                               f_out=f_out, alpha=alpha, apply_elu=apply_elu,
                               out_width=out_width)

    out_bytes = jnp.dtype(out_dtype).itemsize
    # Per-grid-step VMEM footprint: adj stripe (i8) + resident Wh (bf16) +
    # logit halves + output block + ~4 live (tile, N) f32 softmax temporaries.
    per_block = (tile * n
                 + 2 * n * width
                 + 4 * (tile + n) * num_heads
                 + out_bytes * tile * out_width
                 + 4 * 4 * tile * n)
    # Clamp to the smallest per-core VMEM across generations (v7x: 64 MiB).
    # TODO(synk): on v5e/v6e (128 MiB VMEM) raise to ~100 MiB / tile=512 for big N.
    vmem_limit = int(min(max(2 * per_block, 16 << 20), 64 << 20))

    nblocks = grid[0]
    cost = pl.CostEstimate(
        flops=int(2 * n * n * width + 6 * n * n * num_heads),
        transcendentals=int(n * n * num_heads + 2 * n * num_heads),
        bytes_accessed=int(n * n + nblocks * 2 * n * width
                           + out_bytes * n * out_width
                           + 4 * n * 3 * num_heads),
    )

    return pl.pallas_call(
        kernel,
        out_shape=jax.ShapeDtypeStruct((n, out_width), out_dtype),
        grid_spec=pltpu.PrefetchScalarGridSpec(
            num_scalar_prefetch=0,
            grid=grid,
            in_specs=[
                pl.BlockSpec((tile, n), lambda i: (i, 0)),             # adj stripe i8
                pl.BlockSpec((n, width), lambda i: (0, 0)),            # Wh (bf16)
                pl.BlockSpec((tile, num_heads), lambda i: (i, 0)),     # Wh1 rows
                pl.BlockSpec((num_heads, n), lambda i: (0, 0)),        # Wh2^T
            ],
            out_specs=pl.BlockSpec((tile, out_width), lambda i: (i, 0)),
        ),
        compiler_params=pltpu.CompilerParams(
            dimension_semantics=("parallel",),
            vmem_limit_bytes=vmem_limit),
        cost_estimate=cost,
    )(adj_mask_i8, wh_bf16, wh1, wh2t)


def gat_forward(x, adj, params, *, alpha):
    # GAT.forward (inference): dropout -> identity; multi-head level (ELU,
    # concat) -> dropout -> out_att; the final F.elu is folded into the second
    # level's kernel call.
    adj_mask = (adj > 0).astype(jnp.int8)
    w_heads = [w for (w, _) in params["heads"]]
    a_heads = [a for (_, a) in params["heads"]]
    # Level 1: hidden activation emitted in bf16 (only ever consumed by bf16
    # matmuls), 128-lane zero padded.
    h = gat_multihead_layer(x, adj_mask, w_heads, a_heads, alpha=alpha,
                            apply_elu=True, out_dtype=jnp.bfloat16)
    w_o, a_o = params["out"]
    # Keep the hidden activation in its padded form; zero-pad the output
    # layer's weight ROWS to match (padded columns contribute nothing).
    w_o_pad = jnp.pad(w_o, ((0, h.shape[1] - w_o.shape[0]), (0, 0)))
    out = gat_multihead_layer(h, adj_mask, [w_o_pad], [a_o], alpha=alpha,
                              apply_elu=True, out_dtype=jnp.float32)
    return out[:, :w_o.shape[1]]


# ----------------------------- pure-JAX reference ----------------------------
# Mirrors the kernel's precision class (bf16 matmul operands, f32 accumulate,
# folded attention vectors).  Against the true fp32 PyTorch GAT the error is
# dominated by the bf16 MXU rounding, not by the kernel structure.
def _bf16_dot(a, b):
    return jnp.dot(a.astype(jnp.bfloat16), b.astype(jnp.bfloat16),
                   preferred_element_type=jnp.float32)


def _reference_layer(h, adj, w, a, alpha, apply_elu):
    f_out = w.shape[1]
    wh = _bf16_dot(h, w)
    wh1 = _bf16_dot(h, jnp.dot(w, a[:f_out]))
    wh2 = _bf16_dot(h, jnp.dot(w, a[f_out:]))
    e = wh1 + wh2.T
    e = jnp.maximum(e, alpha * e)
    bias = jnp.where(adj > 0, jnp.float32(0.0), jnp.float32(-2.0 ** 31))
    att = e + bias
    att = att - jnp.max(att, axis=1, keepdims=True)
    p = jnp.exp(att)
    hp = _bf16_dot(p, wh) / jnp.sum(p, axis=1, keepdims=True)
    return jnp.where(hp > 0, hp, jnp.exp(hp) - 1.0) if apply_elu else hp


def _reference_gat(x, adj, params, alpha):
    heads = [_reference_layer(x, adj, w, a, alpha, True)
             for (w, a) in params["heads"]]
    h = jnp.concatenate(heads, axis=1)
    w_o, a_o = params["out"]
    return _reference_layer(h, adj, w_o, a_o, alpha, True)


# ------------------------------- parameter init ------------------------------
def xavier_uniform(key, shape, gain):
    fan_in, fan_out = shape
    bound = gain * math.sqrt(6.0 / (fan_in + fan_out))
    return jax.random.uniform(key, shape, jnp.float32, -bound, bound)


if __name__ == "__main__":
    N, nfeat, nhid, nclass, nheads = 64, 32, 16, 8, 4
    alpha = 0.2
    # dropout = 0.5 in the PyTorch module, but training=False -> identity.

    key = jax.random.PRNGKey(0)
    keys = jax.random.split(key, 3 + 2 * nheads)

    x = jax.random.normal(keys[0], (N, nfeat), jnp.float32)
    adj_rand = (jax.random.uniform(keys[1], (N, N)) > 0.7).astype(jnp.float32)
    adj = jnp.clip(adj_rand + jnp.eye(N, dtype=jnp.float32), 0.0, 1.0)

    gain = 1.414
    head_params = []
    for i in range(nheads):
        w_k = xavier_uniform(keys[2 + 2 * i], (nfeat, nhid), gain)
        a_k = xavier_uniform(keys[3 + 2 * i], (2 * nhid, 1), gain)
        head_params.append((w_k, a_k))
    k_o = jax.random.split(keys[2 + 2 * nheads], 2)
    w_o = xavier_uniform(k_o[0], (nhid * nheads, nclass), gain)
    a_o = xavier_uniform(k_o[1], (2 * nclass, 1), gain)
    params = {"heads": head_params, "out": (w_o, a_o)}

    out = gat_forward(x, adj, params, alpha=alpha)
    out = jax.block_until_ready(out)

    ref = _reference_gat(x, adj, params, alpha)
    assert out.shape == (N, nclass), out.shape
    max_err = float(jnp.max(jnp.abs(out - ref)))
    assert jnp.allclose(out, ref, rtol=2e-2, atol=2e-2), max_err

    print("KERNEL_OK")
</pallas_src>

<mosaic_0001>
module attributes {stable_mosaic.version = 11 : i64} {
  func.func @_gat_project_kernel(%arg0: i32, %arg1: memref<32x32xf32, #tpu.memory_space<vmem>>, %arg2: memref<32x64xf32, #tpu.memory_space<vmem>>, %arg3: memref<32x8xf32, #tpu.memory_space<vmem>>, %arg4: memref<32x64xbf16, #tpu.memory_space<vmem>>, %arg5: memref<32x8xf32, #tpu.memory_space<vmem>>) attributes {dimension_semantics = [#tpu.dimension_semantics<parallel>], iteration_bounds = array<i64: 2>, scalar_prefetch = 0 : i64, scratch_operands = 0 : i64, tpu.core_type = #tpu.core_type<tc>, window_params = [{transform_indices = @transform_0, window_bounds = array<i64: 32, 32>}, {pipeline_mode = #tpu.pipeline_mode<synchronous>, transform_indices = @transform_1, window_bounds = array<i64: 32, 64>}, {pipeline_mode = #tpu.pipeline_mode<synchronous>, transform_indices = @transform_2, window_bounds = array<i64: 32, 8>}, {transform_indices = @transform_3, window_bounds = array<i64: 32, 64>}, {transform_indices = @transform_4, window_bounds = array<i64: 32, 8>}]} {
    %c0 = arith.constant 0 : index
    %c0_0 = arith.constant 0 : index
    %0 = vector.load %arg1[%c0, %c0_0] : memref<32x32xf32, #tpu.memory_space<vmem>>, vector<32x32xf32>
    %1 = arith.truncf %0 : vector<32x32xf32> to vector<32x32xbf16>
    %c0_1 = arith.constant 0 : index
    %c0_2 = arith.constant 0 : index
    %2 = vector.load %arg2[%c0_1, %c0_2] : memref<32x64xf32, #tpu.memory_space<vmem>>, vector<32x64xf32>
    %3 = arith.truncf %2 : vector<32x64xf32> to vector<32x64xbf16>
    %cst = arith.constant dense<0.000000e+00> : vector<32x64xf32>
    %4 = tpu.matmul %1, %3, %cst {dimension_numbers = #tpu.dot_dimension_numbers<[1], [0], [0], [1], [0, 0, 1, 1], [], []>} : vector<32x32xbf16>, vector<32x64xbf16>, vector<32x64xf32> -> vector<32x64xf32>
    %5 = arith.truncf %4 : vector<32x64xf32> to vector<32x64xbf16>
    %c0_3 = arith.constant 0 : index
    %c0_4 = arith.constant 0 : index
    %6 = vector.load %arg4[%c0_3, %c0_4] : memref<32x64xbf16, #tpu.memory_space<vmem>>, vector<32x64xbf16>
    tpu.vector_store %arg4[%c0_3, %c0_4], %5 {strides = array<i32>} : memref<32x64xbf16, #tpu.memory_space<vmem>>, vector<32x64xbf16>,
    %c0_5 = arith.constant 0 : index
    %c0_6 = arith.constant 0 : index
    %7 = vector.load %arg3[%c0_5, %c0_6] : memref<32x8xf32, #tpu.memory_space<vmem>>, vector<32x8xf32>
    %8 = arith.truncf %7 : vector<32x8xf32> to vector<32x8xbf16>
    %cst_7 = arith.constant dense<0.000000e+00> : vector<32x8xf32>
    %9 = tpu.matmul %1, %8, %cst_7 {dimension_numbers = #tpu.dot_dimension_numbers<[1], [0], [0], [1], [0, 0, 1, 1], [], []>} : vector<32x32xbf16>, vector<32x8xbf16>, vector<32x8xf32> -> vector<32x8xf32>
    %c0_8 = arith.constant 0 : index
    %c0_9 = arith.constant 0 : index
    %10 = vector.load %arg5[%c0_8, %c0_9] : memref<32x8xf32, #tpu.memory_space<vmem>>, vector<32x8xf32>
    tpu.vector_store %arg5[%c0_8, %c0_9], %9 {strides = array<i32>} : memref<32x8xf32, #tpu.memory_space<vmem>>, vector<32x8xf32>,
    return
  }
  func.func @transform_0(%arg0: i32) -> (i32, i32) {
    %c0_i32 = arith.constant 0 : i32
    %c0_i32_0 = arith.constant 0 : i32
    return %arg0, %c0_i32 : i32, i32
  }
  func.func @transform_1(%arg0: i32) -> (i32, i32) {
    %c0_i32 = arith.constant 0 : i32
    %c0_i32_0 = arith.constant 0 : i32
    %c0_i32_1 = arith.constant 0 : i32
    return %c0_i32, %c0_i32_0 : i32, i32
  }
  func.func @transform_2(%arg0: i32) -> (i32, i32) {
    %c0_i32 = arith.constant 0 : i32
    %c0_i32_0 = arith.constant 0 : i32
    %c0_i32_1 = arith.constant 0 : i32
    return %c0_i32, %c0_i32_0 : i32, i32
  }
  func.func @transform_3(%arg0: i32) -> (i32, i32) {
    %c0_i32 = arith.constant 0 : i32
    %c0_i32_0 = arith.constant 0 : i32
    return %arg0, %c0_i32 : i32, i32
  }
  func.func @transform_4(%arg0: i32) -> (i32, i32) {
    %c0_i32 = arith.constant 0 : i32
    %c0_i32_0 = arith.constant 0 : i32
    return %arg0, %c0_i32 : i32, i32
  }
}

</mosaic_0001>

<bundles_post_ra>
// kernel: tpu_custom_call.1
= control target key start
LH: loop header
LB: loop body
LE: loop exit
PB: predicated region body
PF: predicated region fallthrough
CT: control target
= control target key end

     0   :  { %10 = vsyncpa [#allocation3], 0  ;;  %s795_s0 = inlined_call_operand.vmem [shape: f32[64,32], index: 0, kind: input, shape index: {}]   ;;  %s796_s1 = inlined_call_operand.vmem [shape: f32[32,64], index: 1, kind: input, shape index: {}]   ;;  %s797_s2 = inlined_call_operand.vmem [shape: f32[32,8], index: 2, kind: input, shape index: {}]   ;;  %s798_s3 = inlined_call_operand.hbm [shape: bf16[64,64], index: 3, kind: output, shape index: {0}]   ;;  %s799_s4 = inlined_call_operand.vmem [shape: f32[64,8], index: 4, kind: output, shape index: {1}]  }
   0x1   :  { %12 = vsyncpa [#allocation3 + $0x1], 0  ;;  %s655_s15 = smov 0   ;;  %s657_s16 = smov 0  }
   0x2   :  { %s659_s17 = smov 0   ;;  %s661_s18 = smov 0  }
   0x3 LB: > { %s676_s19 = sadd.s32 4294967295, %s625_s18   ;;  %s473_s20 = sadd.s32 4294967294, %s625_s18   ;;  %s625_s18 = sphi %s661_s18, %s805_s18   ;;  %s621_s17 = sphi %s659_s17, %s804_s17   ;;  %s617_s16 = sphi %s657_s16, %s803_s16   ;;  %s613_s15 = sphi %s655_s15, %s802_s15  }
   0x4   : > { %s680_s21 = sadd.s32 1, %s625_s18   ;;  %s93_s22 = sadd.s32 1, %s621_s17 }
   0x5   : > { %s90_s23 = ssub.s32 %s625_s18, %s680_s21  ;;  %p103_p0 = scmp.ne.s32.totalorder %s621_s17, %s617_s16 }
   0x6   : > { %p91_p1 = scmp.eq.s32.totalorder %s90_s23, 0  ;;  %p104_p2 = scmp.eq.s32.totalorder %s676_s19, 1 }
   0x7   : > { %p109_p3 = scmp.ne.s32.totalorder %s617_s16, %s613_s15  ;;  %p110_p4 = scmp.eq.s32.totalorder %s473_s20, 1 }
   0x8   : > { %s691_s24 = scalar_select %p91_p1, %s621_s17, %s93_s22  }
   0x9   : > { %p693_p5 = por %p104_p2, %p103_p0  ;;  %p697_p6 = por %p110_p4, %p109_p3 }
   0xa   : > { %p476_p7 = scmp.ge.s32.totalorder %s625_s18, 1  ;;  %p169_p8 = scmp.lt.s32.totalorder %s625_s18, 3 }
   0xc   : > { %p170_p9 = pnand %p476_p7, %p169_p8 }
   0xd   : > { %s478_s7 = sshll.u32 (!%p170_p9), %s676_s19, 2  ;;  %s190_s5 = sand.u32 (!%p170_p9), 1, %s617_s16  }
   0xe   : > { %173 = sbr.rel (%p170_p9) target bundleno = 245 (0xf5), region = 32  ;;  %p201_p10 = scmp.lt.s32.totalorder (!%p170_p9), %s478_s7, 7 }
   0xf   : > { %s477_s6 = sshll.u32 (!%p170_p9), %s190_s5, 4  ;;  %s499_s12 = sshll.u32 (!%p170_p9), %s676_s19, 8 }
  0x10   : > { %s192_s10 = scalar_lea.vmem (!%p170_p9), [#allocation2], %s477_s6  ;;  %s746_s20 = scalar_lea.hbm (!%p170_p9), %s798_s3, %s499_s12 }
  0x11   : > { %s382_s11 = sshll.u32 (!%p170_p9), %s192_s10, 4  ;;  %s755_s19 = scalar_lea.sflag (!%p170_p9), [#allocation3], %s190_s5  ;;  %s741_s11 = int_to_ptr.vmem [resolvable:$true] %s382_s11 }
  0x12   : > { %s565_s22 = scalar_lea.vmem (!%p170_p9), %s741_s11, 256  ;;  %s627_s23 = smov (!%p170_p9), [#allocation2]  }
  0x13   : > { %v222_v0 = vld [vmem:[%s796_s1 + $0x10] sm:$0xff]  ;;  %v223_v1 = vld [vmem:[%s796_s1 + $0x18] sm:$0xff]  ;;  %v220_v5 = vld [vmem:[%s796_s1] sm:$0xff]  ;;  %s807_s7 = smov (!%p201_p10, %s478_s7), 7  ;;  %vm226_vm0 = vcmask 261120   ;;  %vm298_vm1 = vcmask 519168   ;;  %p566_p11 = scmp.ne.s32.totalorder %s741_s11, %s565_s22 }
  0x14   : > { %v305_v2 = vld [vmem:[%s797_s2 + $0x10] sm:$0xff]  ;;  %v225_v3 = vpack.c.bf16 %v223_v1, %v222_v0  ;;  %v306_v4 = vld [vmem:[%s797_s2 + $0x18] sm:$0xff]  ;;  %v221_v6 = vld [vmem:[%s796_s1 + $0x8] sm:$0xff]  ;;  %s479_s27 = sshll.u32 %s807_s7, 3  ;;  %vm358_vm2 = vcmask 64512  }
  0x15   : > { %v308_v7 = vpack.c.bf16 %v306_v4, %v305_v2  ;;  %v224_v8 = vpack.c.bf16 %v221_v6, %v220_v5  ;;  %v303_v9 = vld [vmem:[%s797_s2] sm:$0xff]  ;;  %v304_v10 = vld [vmem:[%s797_s2 + $0x8] sm:$0xff]  ;;  %s204_s30 = scalar_lea.vmem %s795_s0, %s479_s27  ;;  %s211_s9 = scalar_lea.vmem %s799_s4, %s479_s27 }
  0x16   : > { %508 = vmatprep.subr.bf16.mxu0 %v225_v3  ;;  %v307_v11 = vpack.c.bf16 %v304_v10, %v303_v9  ;;  %v214_v12 = vld [vmem:[%s204_s30] sm:$0xff]  ;;  %v215_v13 = vld [vmem:[%s204_s30 + $0x8] sm:$0xff]  ;;  %v216_v14 = vld [vmem:[%s204_s30 + $0x10] sm:$0xff]  ;;  %p567_p12 = pnand %p566_p11, %p693_p5  ;;  %s569_s27 = sshll.u32 %s627_s23, 4  ;;  %s570_s27 = int_to_ptr.vmem [resolvable:$false] %s569_s27 }
  0x17   : > { %516 = vmatprep.subr.bf16.mxu1 %v308_v7  ;;  %509 = vmatpush3.bf16.msra.mxu0 %v225_v3  ;;  %v218_v15 = vpack.c.bf16 %v215_v13, %v214_v12  ;;  %v217_v16 = vld [vmem:[%s204_s30 + $0x18] sm:$0xff]  ;;  %s571_s28 = scalar_lea.vmem %s570_s27, 512  ;;  %p572_p0 = scmp.lt.s32.totalorder %s741_s11, %s570_s27 }
  0x18   : > { %517 = vmatpush3.bf16.msra.mxu1 %v308_v7  ;;  %510 = vmatprep.subr.bf16.mxu0 %v224_v8  ;;  %v219_v17 = vpack.c.bf16 %v217_v16, %v216_v14  ;;  %p568_p13 = pneg %p567_p12  ;;  %p573_p1 = scmp.lt.s32.totalorder %s571_s28, %s565_s22 }
  0x19   : > { %518 = vmatprep.subr.bf16.mxu1 %v307_v11  ;;  %512 = vmatprep.mubr.msk.bf16.mxu0 %vm226_vm0, %v218_v15 }
  0x1a   : > { %520 = vmatprep.mubr.msk.bf16.mxu1 %vm226_vm0, %v218_v15  ;;  %p574_p2 = por %p573_p1, %p572_p0 }
  0x1b   : > { %511 = vmatpush3.bf16.msra.mxu0 %v224_v8 }
  0x1c   : > { %519 = vmatpush3.bf16.msra.mxu1 %v307_v11  ;;  %p575_p3 = pnand %p574_p2, %p568_p13 }
  0x1e   : > { %513 = vmatmul.mubr.msk.bf16.vlgmr.msra.gmra.mxu0 %vm226_vm0, %v219_v17 }
  0x1f   : > { %521 = vmatmul.mubr.msk.bf16.vlgmr.msra.gmra.mxu1 %vm226_vm0, %v219_v17 }
  0xde   : > { %v514_v18 = vpop.f32.mrf.mxu0 }
  0xdf   : > { %v497_v19 = vpack.c.bf16 %v514_v18, %v514_v18  ;;  %v522_v20 = vpop.f32.mrf.mxu1 }
  0xe0   : > { %v267_v21 = vpop.f32.mrf.mxu0  ;;  %361 = vst.msk [vmem:[%s211_s9 + $0x10] sm:$0xff] %vm358_vm2, %v522_v20 }
  0xe1   : > { %301 = vst.msk [vmem:[%s192_s10 + $0x8] sm:$0xf] %vm298_vm1, %v497_v19  ;;  %v495_v22 = vpack.c.bf16 %v267_v21, %v267_v21  ;;  %v343_v23 = vpop.f32.mrf.mxu1 }
  0xe2   : > { %359 = vst.msk [vmem:[%s211_s9] sm:$0xff] %vm358_vm2, %v343_v23  ;;  %v515_v24 = vpop.f32.mrf.mxu0 }
  0xe3   : > { %299 = vst.msk [vmem:[%s192_s10] sm:$0xf] %vm298_vm1, %v495_v22  ;;  %v498_v25 = vpack.c.bf16 %v515_v24, %v515_v24  ;;  %v523_v26 = vpop.f32.mrf.mxu1 }
  0xe4   : > { %v270_v27 = vpop.f32.mrf.mxu0  ;;  %362 = vst.msk [vmem:[%s211_s9 + $0x18] sm:$0xff] %vm358_vm2, %v523_v26 }
  0xe5   : > { %302 = vst.msk [vmem:[%s192_s10 + $0xc] sm:$0xf] %vm298_vm1, %v498_v25  ;;  %v496_v28 = vpack.c.bf16 %v270_v27, %v270_v27  ;;  %v346_v29 = vpop.f32.mrf.mxu1 }
  0xe6   : > { %360 = vst.msk [vmem:[%s211_s9 + $0x8] sm:$0xff] %vm358_vm2, %v346_v29 }
  0xe7   : > { %300 = vst.msk [vmem:[%s192_s10 + $0x4] sm:$0xf] %vm298_vm1, %v496_v28 }
  0xe8   : > { %578 = shalt.err (!%p575_p3)
}
  0xe9   : > { %s579_s29 = scalar_lea.hbm %s746_s20, 256  ;;  %s583_s6 = scalar_lea.hbm %s798_s3, 512 }
  0xea   : > { %p580_p4 = scmp.ne.s32.totalorder %s746_s20, %s579_s29  ;;  %p584_p9 = scmp.lt.s32.totalorder %s746_s20, %s798_s3 }
  0xeb   : > { %p585_p10 = scmp.lt.s32.totalorder %s583_s6, %s579_s29 }
  0xec   : > { %p581_p7 = pnand %p580_p4, %p693_p5 }
  0xed   : > { %p586_p11 = por %p585_p10, %p584_p9 }
  0xee   : > { %p582_p8 = pneg %p581_p7 }
  0xf0   : > { %p587_p12 = pnand %p586_p11, %p582_p8 }
  0xf2   : > { %590 = shalt.err (!%p587_p12)
}
  0xf3   : > { %s628_s9 = smov 64   ;;  %s629_s10 = smov 4  }
  0xf4   : > { %524 = dma.vmem_to_hbm [thread:$0]  (%p693_p5), %s741_s11, 256, %s746_s20, %s755_s19, %s628_s9, %s628_s9, %s629_s10  }
  0xf5 PF: > { %p530_p13 = scmp.ge.s32.totalorder %s625_s18, 2  ;;  %s401_s12 = sand.u32 1, %s613_s15  }
  0xf6   : > { %s402_s13 = scalar_lea.sflag [#allocation3], %s401_s12 }
  0xf7   : > { %p527_p0 = pnand %p530_p13, %p697_p6 }
  0xf9   : > { %p528_p1 = pneg %p527_p0 }
  0xfb   : > { %608 = dma.done.wait (%p528_p1), %s402_s13, 256  }
  0xfc   : > { %610 = vsyncadd (%p528_p1), %s402_s13, 4294967040  ;;  %p15_p2 = scmp.ge.s32.totalorder %s680_s21, 4   ;;  %s802_s15 = smov %s617_s16 }
  0xfd   : > { %s803_s16 = smov %s621_s17  ;;  %s804_s17 = smov %s691_s24 }
  0xfe   : > { %s805_s18 = smov %s680_s21  ;;  %17 = sbr.rel (!%p15_p2) target bundleno = 3 (0x3), region = 79 }
 0x103   :  { %415 = vsyncpa [#allocation3], 1 }
 0x104   :  { %417 = vsyncpa [#allocation3 + $0x1], 1 }

</bundles_post_ra>
